<compile_context>
chip_gen: v7x
topology: tpu7x:2x2x1
jax: 0.10.0
libtpu: 0.0.40
codegen_flags: <defaults>
</compile_context>

<pallas_src>
import jax
import jax.numpy as jnp
from jax.experimental import pallas as pl
from jax.experimental.pallas import tpu as pltpu

# Deterministic stand-ins for argparse values.
STRONG_AUG = 0.8   # args.strong_aug
WEAK_AUG = 0.2     # args.weak_aug

_LANES = 128
# (2048, 128) f32 tile = 1 MiB per stream; 3 streams x 2 pipeline buffers
# = 6 MiB of VMEM -> comfortable headroom on v5e/v6e (128 MiB) and v7x (64 MiB).
_DEFAULT_TILE_ROWS = 2048


def _hash_u32(x):
    """lowbias32 integer finalizer (good avalanche, pure VPU int ops)."""
    x = x ^ (x >> 16)
    x = x * jnp.uint32(0x7FEB352D)
    x = x ^ (x >> 15)
    x = x * jnp.uint32(0x846CA68B)
    x = x ^ (x >> 16)
    return x


def _approx_std_normal(h):
    """~N(0,1) from one 32-bit random word via a 4-byte CLT (Irwin-Hall) sum.

    Chosen over Box-Muller so the noise path uses no transcendentals (keeps the
    kernel memory-bound rather than EUP-bound).
    """
    mask = jnp.uint32(0xFF)
    s = (h & mask) + ((h >> 8) & mask) + ((h >> 16) & mask) + (h >> 24)
    s = s.astype(jnp.int32).astype(jnp.float32)
    # mean of 4 bytes = 510, std = sqrt(4 * (256^2 - 1) / 12) = 147.80
    return (s - 510.0) * jnp.float32(0.00676587)


def _aug_kernel(seed_ref, std_ref, x_ref, s_ref, w_ref):
    """One (TILE_ROWS, 128) tile: generate two noise fields and add them.

    seed_ref : SMEM int32[1]        - PRNG seed
    std_ref  : SMEM float32[2]      - [strong_std, weak_std]
    x_ref    : VMEM float32[T, 128] - input tile
    s_ref    : VMEM float32[T, 128] - strongly augmented output tile
    w_ref    : VMEM float32[T, 128] - weakly augmented output tile
    """
    tile_rows, lanes = x_ref.shape
    s_std = std_ref[0]
    w_std = std_ref[1]
    seed = seed_ref[0].astype(jnp.uint32)

    # Global element index of every lane in this tile -> per-tile independent
    # noise streams (seeding depends on pl.program_id, as required by tiling).
    row0 = pl.program_id(0) * tile_rows
    rows = jax.lax.broadcasted_iota(jnp.int32, (tile_rows, lanes), 0)
    cols = jax.lax.broadcasted_iota(jnp.int32, (tile_rows, lanes), 1)
    idx = ((row0 + rows) * lanes + cols).astype(jnp.uint32)

    base = idx * jnp.uint32(0x9E3779B1) + seed * jnp.uint32(0x85EBCA77)
    n_strong = _approx_std_normal(_hash_u32(base ^ jnp.uint32(0x68E31DA4)))
    n_weak = _approx_std_normal(_hash_u32(base ^ jnp.uint32(0xB5297A4D)))

    # torch.normal(mean=0.5, std=std) == 0.5 + std * N(0, 1); hoist the common
    # `x + 0.5` so each output costs only one extra FMA-like pair of VPU ops.
    x_plus_mean = x_ref[...] + 0.5
    s_ref[...] = x_plus_mean + s_std * n_strong
    w_ref[...] = x_plus_mean + w_std * n_weak


def augmentation_pair(x, strong_std, weak_std, seed, tile_rows=_DEFAULT_TILE_ROWS):
    """Pallas kernel call: returns (input_s, input_w), both same shape as x."""
    orig_shape = x.shape
    orig_dtype = x.dtype
    n = x.size

    # Flatten to a lane-dense (rows, 128) slab; pad so rows % 8 == 0 (8,128 rule).
    xf = x.reshape(-1).astype(jnp.float32)
    pad = (-n) % (8 * _LANES)
    if pad:
        xf = jnp.pad(xf, (0, pad))
    rows = xf.size // _LANES
    x2 = xf.reshape(rows, _LANES)

    tile_rows = min(tile_rows, rows)
    grid = (pl.cdiv(rows, tile_rows),)

    seed_arr = jnp.asarray([seed], dtype=jnp.int32)
    std_arr = jnp.asarray([strong_std, weak_std], dtype=jnp.float32)

    tile_spec = pl.BlockSpec((tile_rows, _LANES), lambda i: (i, 0))
    smem_spec = pl.BlockSpec(memory_space=pltpu.MemorySpace.SMEM)
    out_sds = jax.ShapeDtypeStruct((rows, _LANES), jnp.float32)

    s2, w2 = pl.pallas_call(
        _aug_kernel,
        out_shape=(out_sds, out_sds),
        grid=grid,
        in_specs=[smem_spec, smem_spec, tile_spec],
        out_specs=(tile_spec, tile_spec),
        compiler_params=pltpu.CompilerParams(
            dimension_semantics=("parallel",)),   # v7x: split rows across 2 TCs
        cost_estimate=pl.CostEstimate(
            flops=64 * rows * _LANES,
            transcendentals=0,
            bytes_accessed=12 * rows * _LANES),
    )(seed_arr, std_arr, x2)

    def _unflatten(y2):
        y = y2.reshape(-1)
        if pad:
            y = y[:n]
        return y.reshape(orig_shape).astype(orig_dtype)

    return _unflatten(s2), _unflatten(w2)


def model_forward(x, compute_model=False, seed=0):
    """Mirrors Model.forward."""
    if not compute_model:
        return augmentation_pair(x, STRONG_AUG, WEAK_AUG, seed)
    # TODO(synk): Conv_EEG backbone is an external, undefined module (its
    # architecture depends on args.dataset / args.method) and cannot be
    # faithfully translated from the given source.
    raise NotImplementedError("Conv_EEG backbone is not defined in the source module")


if __name__ == "__main__":
    key = jax.random.PRNGKey(0)
    # Small NCHW EEG-like input: batch=2, channels=4, H=16, W=16.
    x = jax.random.normal(key, (2, 4, 16, 16), dtype=jnp.float32)

    input_s, input_w = model_forward(x, compute_model=False, seed=0)
    jax.block_until_ready(input_s)
    jax.block_until_ready(input_w)

    assert input_s.shape == x.shape and input_w.shape == x.shape
    assert input_s.dtype == jnp.float32 and input_w.dtype == jnp.float32

    ds = input_s - x
    dw = input_w - x
    # Mean offset of (output - input) should be ~0.5 for both augmentations.
    assert abs(float(jnp.mean(ds)) - 0.5) < 0.2, float(jnp.mean(ds))
    assert abs(float(jnp.mean(dw)) - 0.5) < 0.1, float(jnp.mean(dw))
    # Noise scale should track the configured std values (loose bounds).
    assert 0.55 < float(jnp.std(ds)) < 1.05, float(jnp.std(ds))
    assert 0.10 < float(jnp.std(dw)) < 0.30, float(jnp.std(dw))

    print("KERNEL_OK")
</pallas_src>

<mosaic_0001>
module attributes {stable_mosaic.version = 11 : i64} {
  func.func @_aug_kernel(%arg0: i32, %arg1: memref<1xi32, #tpu.memory_space<smem>>, %arg2: memref<2xf32, #tpu.memory_space<smem>>, %arg3: memref<16x128xf32, #tpu.memory_space<vmem>>, %arg4: memref<16x128xf32, #tpu.memory_space<vmem>>, %arg5: memref<16x128xf32, #tpu.memory_space<vmem>>) attributes {dimension_semantics = [#tpu.dimension_semantics<parallel>], iteration_bounds = array<i64: 1>, scalar_prefetch = 0 : i64, scratch_operands = 0 : i64, tpu.core_type = #tpu.core_type<tc>, window_params = [{transform_indices = @transform_0, window_bounds = array<i64: 1>}, {transform_indices = @transform_1, window_bounds = array<i64: 2>}, {transform_indices = @transform_2, window_bounds = array<i64: 16, 128>}, {transform_indices = @transform_3, window_bounds = array<i64: 16, 128>}, {transform_indices = @transform_4, window_bounds = array<i64: 16, 128>}]} {
    %c0 = arith.constant 0 : index
    %0 = memref.load %arg2[%c0] : memref<2xf32, #tpu.memory_space<smem>>
    %c1 = arith.constant 1 : index
    %1 = memref.load %arg2[%c1] : memref<2xf32, #tpu.memory_space<smem>>
    %c0_0 = arith.constant 0 : index
    %2 = memref.load %arg1[%c0_0] : memref<1xi32, #tpu.memory_space<smem>>
    %c16_i32 = arith.constant 16 : i32
    %3 = arith.muli %arg0, %c16_i32 : i32
    %4 = tpu.iota {dimensions = array<i32: 0>} : vector<16x128xi32>
    %5 = tpu.iota {dimensions = array<i32: 1>} : vector<16x128xi32>
    %6 = vector.broadcast %3 : i32 to vector<16x128xi32>
    %7 = arith.addi %6, %4 : vector<16x128xi32>
    %c128_i32 = arith.constant 128 : i32
    %8 = vector.broadcast %c128_i32 : i32 to vector<16x128xi32>
    %9 = arith.muli %7, %8 : vector<16x128xi32>
    %10 = arith.addi %9, %5 : vector<16x128xi32>
    %c-1640531535_i32 = arith.constant -1640531535 : i32
    %11 = vector.broadcast %c-1640531535_i32 : i32 to vector<16x128xi32>
    %12 = arith.muli %10, %11 : vector<16x128xi32>
    %c-2048144777_i32 = arith.constant -2048144777 : i32
    %13 = arith.muli %2, %c-2048144777_i32 : i32
    %14 = vector.broadcast %13 : i32 to vector<16x128xi32>
    %15 = arith.addi %12, %14 : vector<16x128xi32>
    %c1759714724_i32 = arith.constant 1759714724 : i32
    %16 = vector.broadcast %c1759714724_i32 : i32 to vector<16x128xi32>
    %17 = arith.xori %15, %16 : vector<16x128xi32>
    %c16_i32_1 = arith.constant 16 : i32
    %18 = vector.broadcast %c16_i32_1 : i32 to vector<16x128xi32>
    %19 = arith.shrui %17, %18 : vector<16x128xi32>
    %20 = arith.xori %17, %19 : vector<16x128xi32>
    %c2146121005_i32 = arith.constant 2146121005 : i32
    %21 = vector.broadcast %c2146121005_i32 : i32 to vector<16x128xi32>
    %22 = arith.muli %20, %21 : vector<16x128xi32>
    %c15_i32 = arith.constant 15 : i32
    %23 = vector.broadcast %c15_i32 : i32 to vector<16x128xi32>
    %24 = arith.shrui %22, %23 : vector<16x128xi32>
    %25 = arith.xori %22, %24 : vector<16x128xi32>
    %c-2073254261_i32 = arith.constant -2073254261 : i32
    %26 = vector.broadcast %c-2073254261_i32 : i32 to vector<16x128xi32>
    %27 = arith.muli %25, %26 : vector<16x128xi32>
    %c16_i32_2 = arith.constant 16 : i32
    %28 = vector.broadcast %c16_i32_2 : i32 to vector<16x128xi32>
    %29 = arith.shrui %27, %28 : vector<16x128xi32>
    %30 = arith.xori %27, %29 : vector<16x128xi32>
    %c255_i32 = arith.constant 255 : i32
    %31 = vector.broadcast %c255_i32 : i32 to vector<16x128xi32>
    %32 = arith.andi %30, %31 : vector<16x128xi32>
    %c8_i32 = arith.constant 8 : i32
    %33 = vector.broadcast %c8_i32 : i32 to vector<16x128xi32>
    %34 = arith.shrui %30, %33 : vector<16x128xi32>
    %c255_i32_3 = arith.constant 255 : i32
    %35 = vector.broadcast %c255_i32_3 : i32 to vector<16x128xi32>
    %36 = arith.andi %34, %35 : vector<16x128xi32>
    %37 = arith.addi %32, %36 : vector<16x128xi32>
    %c16_i32_4 = arith.constant 16 : i32
    %38 = vector.broadcast %c16_i32_4 : i32 to vector<16x128xi32>
    %39 = arith.shrui %30, %38 : vector<16x128xi32>
    %c255_i32_5 = arith.constant 255 : i32
    %40 = vector.broadcast %c255_i32_5 : i32 to vector<16x128xi32>
    %41 = arith.andi %39, %40 : vector<16x128xi32>
    %42 = arith.addi %37, %41 : vector<16x128xi32>
    %c24_i32 = arith.constant 24 : i32
    %43 = vector.broadcast %c24_i32 : i32 to vector<16x128xi32>
    %44 = arith.shrui %30, %43 : vector<16x128xi32>
    %45 = arith.addi %42, %44 : vector<16x128xi32>
    %46 = arith.sitofp %45 : vector<16x128xi32> to vector<16x128xf32>
    %cst = arith.constant 5.100000e+02 : f32
    %47 = vector.broadcast %cst : f32 to vector<16x128xf32>
    %48 = arith.subf %46, %47 : vector<16x128xf32>
    %cst_6 = arith.constant 6.765870e-03 : f32
    %49 = vector.broadcast %cst_6 : f32 to vector<16x128xf32>
    %50 = arith.mulf %48, %49 : vector<16x128xf32>
    %c-1255572915_i32 = arith.constant -1255572915 : i32
    %51 = vector.broadcast %c-1255572915_i32 : i32 to vector<16x128xi32>
    %52 = arith.xori %15, %51 : vector<16x128xi32>
    %c16_i32_7 = arith.constant 16 : i32
    %53 = vector.broadcast %c16_i32_7 : i32 to vector<16x128xi32>
    %54 = arith.shrui %52, %53 : vector<16x128xi32>
    %55 = arith.xori %52, %54 : vector<16x128xi32>
    %c2146121005_i32_8 = arith.constant 2146121005 : i32
    %56 = vector.broadcast %c2146121005_i32_8 : i32 to vector<16x128xi32>
    %57 = arith.muli %55, %56 : vector<16x128xi32>
    %c15_i32_9 = arith.constant 15 : i32
    %58 = vector.broadcast %c15_i32_9 : i32 to vector<16x128xi32>
    %59 = arith.shrui %57, %58 : vector<16x128xi32>
    %60 = arith.xori %57, %59 : vector<16x128xi32>
    %c-2073254261_i32_10 = arith.constant -2073254261 : i32
    %61 = vector.broadcast %c-2073254261_i32_10 : i32 to vector<16x128xi32>
    %62 = arith.muli %60, %61 : vector<16x128xi32>
    %c16_i32_11 = arith.constant 16 : i32
    %63 = vector.broadcast %c16_i32_11 : i32 to vector<16x128xi32>
    %64 = arith.shrui %62, %63 : vector<16x128xi32>
    %65 = arith.xori %62, %64 : vector<16x128xi32>
    %c255_i32_12 = arith.constant 255 : i32
    %66 = vector.broadcast %c255_i32_12 : i32 to vector<16x128xi32>
    %67 = arith.andi %65, %66 : vector<16x128xi32>
    %c8_i32_13 = arith.constant 8 : i32
    %68 = vector.broadcast %c8_i32_13 : i32 to vector<16x128xi32>
    %69 = arith.shrui %65, %68 : vector<16x128xi32>
    %c255_i32_14 = arith.constant 255 : i32
    %70 = vector.broadcast %c255_i32_14 : i32 to vector<16x128xi32>
    %71 = arith.andi %69, %70 : vector<16x128xi32>
    %72 = arith.addi %67, %71 : vector<16x128xi32>
    %c16_i32_15 = arith.constant 16 : i32
    %73 = vector.broadcast %c16_i32_15 : i32 to vector<16x128xi32>
    %74 = arith.shrui %65, %73 : vector<16x128xi32>
    %c255_i32_16 = arith.constant 255 : i32
    %75 = vector.broadcast %c255_i32_16 : i32 to vector<16x128xi32>
    %76 = arith.andi %74, %75 : vector<16x128xi32>
    %77 = arith.addi %72, %76 : vector<16x128xi32>
    %c24_i32_17 = arith.constant 24 : i32
    %78 = vector.broadcast %c24_i32_17 : i32 to vector<16x128xi32>
    %79 = arith.shrui %65, %78 : vector<16x128xi32>
    %80 = arith.addi %77, %79 : vector<16x128xi32>
    %81 = arith.sitofp %80 : vector<16x128xi32> to vector<16x128xf32>
    %cst_18 = arith.constant 5.100000e+02 : f32
    %82 = vector.broadcast %cst_18 : f32 to vector<16x128xf32>
    %83 = arith.subf %81, %82 : vector<16x128xf32>
    %cst_19 = arith.constant 6.765870e-03 : f32
    %84 = vector.broadcast %cst_19 : f32 to vector<16x128xf32>
    %85 = arith.mulf %83, %84 : vector<16x128xf32>
    %c0_20 = arith.constant 0 : index
    %c0_21 = arith.constant 0 : index
    %86 = vector.load %arg3[%c0_20, %c0_21] : memref<16x128xf32, #tpu.memory_space<vmem>>, vector<16x128xf32>
    %cst_22 = arith.constant 5.000000e-01 : f32
    %87 = vector.broadcast %cst_22 : f32 to vector<16x128xf32>
    %88 = arith.addf %86, %87 : vector<16x128xf32>
    %89 = vector.broadcast %0 : f32 to vector<16x128xf32>
    %90 = arith.mulf %89, %50 : vector<16x128xf32>
    %91 = arith.addf %88, %90 : vector<16x128xf32>
    %c0_23 = arith.constant 0 : index
    %c0_24 = arith.constant 0 : index
    %92 = vector.load %arg4[%c0_23, %c0_24] : memref<16x128xf32, #tpu.memory_space<vmem>>, vector<16x128xf32>
    tpu.vector_store %arg4[%c0_23, %c0_24], %91 {strides = array<i32>} : memref<16x128xf32, #tpu.memory_space<vmem>>, vector<16x128xf32>,
    %93 = vector.broadcast %1 : f32 to vector<16x128xf32>
    %94 = arith.mulf %93, %85 : vector<16x128xf32>
    %95 = arith.addf %88, %94 : vector<16x128xf32>
    %c0_25 = arith.constant 0 : index
    %c0_26 = arith.constant 0 : index
    %96 = vector.load %arg5[%c0_25, %c0_26] : memref<16x128xf32, #tpu.memory_space<vmem>>, vector<16x128xf32>
    tpu.vector_store %arg5[%c0_25, %c0_26], %95 {strides = array<i32>} : memref<16x128xf32, #tpu.memory_space<vmem>>, vector<16x128xf32>,
    return
  }
  func.func @transform_0(%arg0: i32) -> i32 {
    %c0_i32 = arith.constant 0 : i32
    %c0_i32_0 = arith.constant 0 : i32
    return %c0_i32 : i32
  }
  func.func @transform_1(%arg0: i32) -> i32 {
    %c0_i32 = arith.constant 0 : i32
    %c0_i32_0 = arith.constant 0 : i32
    return %c0_i32 : i32
  }
  func.func @transform_2(%arg0: i32) -> (i32, i32) {
    %c0_i32 = arith.constant 0 : i32
    %c0_i32_0 = arith.constant 0 : i32
    return %arg0, %c0_i32 : i32, i32
  }
  func.func @transform_3(%arg0: i32) -> (i32, i32) {
    %c0_i32 = arith.constant 0 : i32
    %c0_i32_0 = arith.constant 0 : i32
    return %arg0, %c0_i32 : i32, i32
  }
  func.func @transform_4(%arg0: i32) -> (i32, i32) {
    %c0_i32 = arith.constant 0 : i32
    %c0_i32_0 = arith.constant 0 : i32
    return %arg0, %c0_i32 : i32, i32
  }
}

</mosaic_0001>

<bundles_post_ra>
// kernel: tpu_custom_call.1
= control target key start
LH: loop header
LB: loop body
LE: loop exit
PB: predicated region body
PF: predicated region fallthrough
CT: control target
= control target key end

     0   :  { %11 = vsyncpa [#allocation6], 0  ;;  %s396_s0 = inlined_call_operand.<no memory space> [shape: s32[1], index: 0, kind: input, shape index: {}]   ;;  %s397_s1 = inlined_call_operand.vmem [shape: f32[2], index: 1, kind: input, shape index: {}]   ;;  %s398_s2 = inlined_call_operand.hbm [shape: f32[16,128], index: 2, kind: input, shape index: {}]   ;;  %s399_s3 = inlined_call_operand.hbm [shape: f32[16,128], index: 3, kind: output, shape index: {0}]   ;;  %s400_s4 = inlined_call_operand.hbm [shape: f32[16,128], index: 4, kind: output, shape index: {1}]  }
   0x1   :  { %12 = vsyncpa [#allocation4], 0 }
   0x2   :  { %13 = vsyncpa [#allocation5], 0 }
   0x3   :  { %14 = vsyncpa [#allocation10], 0  ;;  %s23_s17 = sshll.u32 %s397_s1, 4  ;;  %s24_s17 = int_to_ptr.vmem [resolvable:$true] %s23_s17 }
   0x4   :  { %s215_s18 = scalar_lea.vmem %s24_s17, 16  ;;  %p220_p1 = scmp.lt.s32.totalorder %s24_s17, %s24_s17 }
   0x5   :  { %p216_p0 = scmp.ne.s32.totalorder %s24_s17, %s215_s18  ;;  %p221_p2 = scmp.lt.s32.totalorder %s215_s18, %s215_s18 }
   0x7   :  { %p222_p3 = por %p221_p2, %p220_p1 }
   0x9   :  { %p223_p4 = pnand %p222_p3, %p216_p0 }
   0xb   :  { %226 = shalt.err (!%p223_p4)
}
   0xc   :  { %s301_s19 = smov [#allocation3]   ;;  %s302_s20 = smov [#allocation7]  }
   0xd   :  { %26 = dma.vmem_to_smem %s24_s17, 16, %s301_s19, [#allocation6]  }
   0xe   :  { %s32_s21 = sshll.u32 %s302_s20, 4  ;;  %s227_s24 = scalar_lea.hbm %s398_s2, 256  ;;  %s33_s21 = int_to_ptr.vmem [resolvable:$true] %s32_s21 }
   0xf   :  { %p228_p5 = scmp.ne.s32.totalorder %s398_s2, %s227_s24  ;;  %p231_p6 = scmp.lt.u32.totalorder %s227_s24, %s398_s2 }
  0x11   :  { %p233_p7 = pnand %p231_p6, %p228_p5 }
  0x13   :  { %236 = shalt.err (!%p233_p7)
}
  0x14   :  { %s237_s28 = scalar_lea.vmem %s33_s21, 256  ;;  %p242_p9 = scmp.lt.s32.totalorder %s33_s21, %s33_s21 }
  0x15   :  { %p238_p8 = scmp.ne.s32.totalorder %s33_s21, %s237_s28  ;;  %p243_p10 = scmp.lt.s32.totalorder %s237_s28, %s237_s28 }
  0x17   :  { %p244_p11 = por %p243_p10, %p242_p9 }
  0x19   :  { %p245_p12 = pnand %p244_p11, %p238_p8 }
  0x1b   :  { %248 = shalt.err (!%p245_p12)
}
  0x1c   :  { %s303_s29 = smov 128   ;;  %s304_s30 = smov 8  }
  0x1d   :  { %38 = dma.hbm_to_vmem [thread:$0]  %s398_s2, 256, %s33_s21, [#allocation4], %s303_s29, %s303_s29, %s304_s30  }
  0x1e   :  { %293 = dma.done.wait [#allocation6], 16  }
  0x1f   :  { %294 = vsyncadd [#allocation6], 4294967280 }
  0x20   :  { %295 = dma.done.wait [#allocation4], 256  }
  0x21   :  { %296 = vsyncadd [#allocation4], 4294967040 }
  0x22   :  { %45 = sfence }
  0x23   :  { %v50_v0 = vlaneseq  ;;  %s64_s9 = smul.u32 2246822519, %s396_s0  ;;  %s353_s0 = sld [smem:[#allocation3]] }
  0x24   :  { %s355_s2 = sld [smem:[#allocation3 + $0x1]]  ;;  %s305_s10 = smov [#allocation8]  }
  0x25   :  { %v51_v1 = vshrl.u32 %v50_v0, 7  ;;  %v54_v2 = vand.u32 127, %v50_v0  ;;  %v65_v7 = vstv %s64_s9  ;;  %s175_s11 = sshll.u32 %s305_s10, 4  ;;  %s306_s12 = smov [#allocation9]   ;;  %s176_s11 = int_to_ptr.vmem [resolvable:$true] %s175_s11 }
  0x26   :  { %s187_s13 = sshll.u32 %s306_s12, 4  ;;  %s249_s14 = scalar_lea.vmem %s176_s11, 256  ;;  %s359_s13 = int_to_ptr.vmem [resolvable:$true] %s187_s13 }
  0x27   :  { %v58_v3 = vmul.u32 128, %v51_v1  ;;  %v52_v4 = vadd.s32 8, %v51_v1  ;;  %p250_p13 = scmp.ne.s32.totalorder %s176_s11, %s249_s14  ;;  %p254_p0 = scmp.lt.s32.totalorder %s176_s11, %s176_s11 }
  0x28   :  { %p255_p1 = scmp.lt.s32.totalorder %s249_s14, %s249_s14 }
  0x29   :  { %v60_v5 = vadd.s32 %v58_v3, %v54_v2  ;;  %v59_v6 = vmul.u32 128, %v52_v4 }
  0x2a   :  { %p256_p2 = por %p255_p1, %p254_p0 }
  0x2b   :  { %v62_v8 = vmul.u32 2654435761, %v60_v5  ;;  %v61_v9 = vadd.s32 %v59_v6, %v54_v2 }
  0x2c   :  { %p257_p3 = pnand %p256_p2, %p250_p13 }
  0x2d   :  { %v66_v10 = vadd.s32 %v65_v7, %v62_v8  ;;  %v63_v11 = vmul.u32 2654435761, %v61_v9 }
  0x2f   :  { %v68_v12 = vxor.u32 1759714724, %v66_v10  ;;  %v67_v13 = vadd.s32 %v65_v7, %v63_v11  ;;  %v110_v14 = vxor.u32 3039394381, %v66_v10 }
  0x31   :  { %v70_v15 = vshrl.u32 %v68_v12, 16  ;;  %v69_v16 = vxor.u32 1759714724, %v67_v13  ;;  %v112_v17 = vshrl.u32 %v110_v14, 16  ;;  %v111_v18 = vxor.u32 3039394381, %v67_v13 }
  0x33   :  { %v72_v19 = vxor.u32 %v70_v15, %v68_v12  ;;  %v71_v20 = vshrl.u32 %v69_v16, 16  ;;  %v114_v21 = vxor.u32 %v112_v17, %v110_v14  ;;  %v113_v22 = vshrl.u32 %v111_v18, 16 }
  0x35   :  { %v74_v23 = vmul.u32 2146121005, %v72_v19  ;;  %v73_v24 = vxor.u32 %v71_v20, %v69_v16  ;;  %v116_v25 = vmul.u32 2146121005, %v114_v21  ;;  %v115_v26 = vxor.u32 %v113_v22, %v111_v18  ;;  %v152_v19 = vld [vmem:[#allocation7] sm:$0xff] }
  0x37   :  { %v76_v27 = vshrl.u32 %v74_v23, 15  ;;  %v75_v28 = vmul.u32 2146121005, %v73_v24  ;;  %v118_v29 = vshrl.u32 %v116_v25, 15  ;;  %v117_v30 = vmul.u32 2146121005, %v115_v26 }
  0x38   :  { %v156_v24 = vstv %s353_s0 }
  0x39   :  { %v78_v31 = vxor.u32 %v76_v27, %v74_v23  ;;  %v77_v32 = vshrl.u32 %v75_v28, 15  ;;  %v120_v33 = vxor.u32 %v118_v29, %v116_v25  ;;  %v119_v34 = vshrl.u32 %v117_v30, 15  ;;  %v153_v29 = vld [vmem:[#allocation7 + $0x8] sm:$0xff] }
  0x3b   :  { %v80_v35 = vmul.u32 2221713035, %v78_v31  ;;  %v79_v36 = vxor.u32 %v77_v32, %v75_v28  ;;  %v122_v37 = vmul.u32 2221713035, %v120_v33  ;;  %v121_v38 = vxor.u32 %v119_v34, %v117_v30 }
  0x3c   :  { %v154_v28 = vadd.f32 0.5, %v152_v19  ;;  %v163_v32 = vstv %s355_s2 }
  0x3d   :  { %v82_v39 = vshrl.u32 %v80_v35, 16  ;;  %v81_v40 = vmul.u32 2221713035, %v79_v36  ;;  %v124_v41 = vshrl.u32 %v122_v37, 16  ;;  %v123_v42 = vmul.u32 2221713035, %v121_v38 }
  0x3f   :  { %v84_v43 = vxor.u32 %v82_v39, %v80_v35  ;;  %v83_v44 = vshrl.u32 %v81_v40, 16  ;;  %v126_v45 = vxor.u32 %v124_v41, %v122_v37  ;;  %v125_v46 = vshrl.u32 %v123_v42, 16 }
  0x40   :  { %v155_v37 = vadd.f32 0.5, %v153_v29 }
  0x41   :  { %v86_v47 = vand.u32 255, %v84_v43  ;;  %v88_v48 = vshrl.u32 %v84_v43, 8  ;;  %v94_v49 = vshrl.u32 %v84_v43, 16  ;;  %v85_v50 = vxor.u32 %v83_v44, %v81_v40 }
  0x42   :  { %v130_v51 = vshrl.u32 %v126_v45, 8  ;;  %v136_v52 = vshrl.u32 %v126_v45, 16  ;;  %v128_v55 = vand.u32 255, %v126_v45  ;;  %v127_v56 = vxor.u32 %v125_v46, %v123_v42 }
  0x43   :  { %v90_v53 = vand.u32 255, %v88_v48  ;;  %v96_v54 = vand.u32 255, %v94_v49  ;;  %v100_v57 = vshrl.u32 %v84_v43, 24  ;;  %v87_v58 = vand.u32 255, %v85_v50 }
  0x44   :  { %v89_v59 = vshrl.u32 %v85_v50, 8  ;;  %v95_v60 = vshrl.u32 %v85_v50, 16  ;;  %v132_v62 = vand.u32 255, %v130_v51  ;;  %v138_v63 = vand.u32 255, %v136_v52 }
  0x45   :  { %v92_v61 = vadd.s32 %v90_v53, %v86_v47  ;;  %v129_v0 = vand.u32 255, %v127_v56  ;;  %v131_v3 = vshrl.u32 %v127_v56, 8  ;;  %v137_v4 = vshrl.u32 %v127_v56, 16 }
  0x46   :  { %v91_v1 = vand.u32 255, %v89_v59  ;;  %v97_v2 = vand.u32 255, %v95_v60  ;;  %v134_v6 = vadd.s32 %v132_v62, %v128_v55  ;;  %v142_v7 = vshrl.u32 %v126_v45, 24 }
  0x47   :  { %v98_v5 = vadd.s32 %v96_v54, %v92_v61  ;;  %v101_v9 = vshrl.u32 %v85_v50, 24  ;;  %v133_v10 = vand.u32 255, %v131_v3  ;;  %v139_v11 = vand.u32 255, %v137_v4 }
  0x48   :  { %v93_v8 = vadd.s32 %v91_v1, %v87_v58  ;;  %v140_v13 = vadd.s32 %v138_v63, %v134_v6  ;;  %v143_v16 = vshrl.u32 %v127_v56, 24 }
  0x49   :  { %v102_v12 = vadd.s32 %v100_v57, %v98_v5  ;;  %v135_v15 = vadd.s32 %v133_v10, %v129_v0 }
  0x4a   :  { %v99_v14 = vadd.s32 %v97_v2, %v93_v8  ;;  %v144_v18 = vadd.s32 %v142_v7, %v140_v13 }
  0x4b   :  { %v104_v17 = vcvt.s32.f32 %v102_v12  ;;  %v141_v21 = vadd.s32 %v139_v11, %v135_v15 }
  0x4c   :  { %v103_v20 = vadd.s32 %v101_v9, %v99_v14  ;;  %v146_v23 = vcvt.s32.f32 %v144_v18 }
  0x4d   :  { %v205_v22 = vadd.f32 -510.0, %v104_v17  ;;  %v145_v26 = vadd.s32 %v143_v16, %v141_v21 }
  0x4e   :  { %v105_v25 = vcvt.s32.f32 %v103_v20  ;;  %v207_v30 = vadd.f32 -510.0, %v146_v23 }
  0x4f   :  { %v108_v27 = vmul.f32 0.00676587, %v205_v22  ;;  %v147_v33 = vcvt.s32.f32 %v145_v26 }
  0x50   :  { %v206_v31 = vadd.f32 -510.0, %v105_v25  ;;  %v150_v35 = vmul.f32 0.00676587, %v207_v30 }
  0x51   :  { %v157_v34 = vmul.f32 %v156_v24, %v108_v27  ;;  %v208_v38 = vadd.f32 -510.0, %v147_v33 }
  0x52   :  { %v109_v36 = vmul.f32 0.00676587, %v206_v31  ;;  %v164_v40 = vmul.f32 %v163_v32, %v150_v35 }
  0x53   :  { %v159_v39 = vadd.f32 %v157_v34, %v154_v28  ;;  %v151_v42 = vmul.f32 0.00676587, %v208_v38 }
  0x54   :  { %v158_v41 = vmul.f32 %v156_v24, %v109_v36  ;;  %v166_v43 = vadd.f32 %v164_v40, %v154_v28 }
  0x55   :  { %161 = vst [vmem:[#allocation8] sm:$0xff] %v159_v39  ;;  %v165_v45 = vmul.f32 %v163_v32, %v151_v42 }
  0x56   :  { %v160_v44 = vadd.f32 %v158_v41, %v155_v37  ;;  %168 = vst [vmem:[#allocation9] sm:$0xff] %v166_v43 }
  0x57   :  { %v167_v46 = vadd.f32 %v165_v45, %v155_v37 }
  0x58   :  { %162 = vst [vmem:[#allocation8 + $0x8] sm:$0xff] %v160_v44 }
  0x59   :  { %260 = shalt.err (!%p257_p3)
}
  0x5a   :  { %s261_s17 = scalar_lea.hbm %s399_s3, 256 }
  0x5b   :  { %p262_p4 = scmp.ne.s32.totalorder %s399_s3, %s261_s17  ;;  %p265_p5 = scmp.lt.u32.totalorder %s261_s17, %s399_s3 }
  0x5d   :  { %p267_p6 = pnand %p265_p5, %p262_p4 }
  0x5f   :  { %270 = shalt.err (!%p267_p6)
}
  0x60   :  { %181 = dma.vmem_to_hbm [thread:$0]  %s176_s11, 256, %s399_s3, [#allocation5], %s303_s29, %s303_s29, %s304_s30   ;;  %169 = vst [vmem:[#allocation9 + $0x8] sm:$0xff] %v167_v46 }
  0x61   :  { %s271_s24 = scalar_lea.vmem %s359_s13, 256  ;;  %p276_p8 = scmp.lt.s32.totalorder %s359_s13, %s359_s13 }
  0x62   :  { %p272_p7 = scmp.ne.s32.totalorder %s359_s13, %s271_s24  ;;  %p277_p9 = scmp.lt.s32.totalorder %s271_s24, %s271_s24 }
  0x64   :  { %p278_p10 = por %p277_p9, %p276_p8 }
  0x66   :  { %p279_p11 = pnand %p278_p10, %p272_p7 }
  0x68   :  { %282 = shalt.err (!%p279_p11)
}
  0x69   :  { %s283_s1 = scalar_lea.hbm %s400_s4, 256 }
  0x6a   :  { %p284_p12 = scmp.ne.s32.totalorder %s400_s4, %s283_s1  ;;  %p287_p13 = scmp.lt.u32.totalorder %s283_s1, %s400_s4 }
  0x6c   :  { %p289_p0 = pnand %p287_p13, %p284_p12 }
  0x6e   :  { %292 = shalt.err (!%p289_p0)
}
  0x6f   :  { %193 = dma.vmem_to_hbm [thread:$0]  %s359_s13, 256, %s400_s4, [#allocation10], %s303_s29, %s303_s29, %s304_s30  }
  0x70   :  { %297 = dma.done.wait [#allocation5], 256  }
  0x71   :  { %298 = vsyncadd [#allocation5], 4294967040 }
  0x72   :  { %299 = dma.done.wait [#allocation10], 256  }
  0x73   :  { %300 = vsyncadd [#allocation10], 4294967040 }
  0x74   :  { %200 = vsyncpa [#allocation4], 1 }
  0x75   :  { %201 = vsyncpa [#allocation5], 1 }
  0x76   :  { %202 = vsyncpa [#allocation10], 1 }
  0x77   :  { %203 = vsyncpa [#allocation6], 1 }

</bundles_post_ra>
